<compile_context>
chip_gen: v6e
topology: v6e:2x2x1
jax: 0.10.0
libtpu: 0.0.40
codegen_flags: <defaults>
</compile_context>

<pallas_src>
import jax
import jax.numpy as jnp
from jax import lax
from jax.experimental import pallas as pl
from jax.experimental.pallas import tpu as pltpu

BN_EPS = 1e-5
VMEM_BUDGET = 48 << 20  # keep under v7x's 64 MiB per-TC VMEM with headroom


def _epilogue(lin, p):
    """bias + ReLU + training-mode BatchNorm1d (biased variance), all f32."""
    bias, gamma, beta = p[0:1, :], p[1:2, :], p[2:3, :]
    r = jnp.maximum(lin + bias, 0.0)                                 # (N, TN)
    mean = jnp.mean(r, axis=0, keepdims=True)                        # (1, TN)
    var = jnp.mean((r - mean) * (r - mean), axis=0, keepdims=True)   # biased
    scale = gamma * lax.rsqrt(var + BN_EPS)                          # EUP rsqrt
    shift = beta - mean * scale
    return r * scale + shift                                         # 1 mul + 1 add / elem


def linear_block_kernel_full_k(x_ref, w_ref, p_ref, o_ref):
    # grid = (j over C_out tiles,)  -- no reduction axis, one full-K matmul.
    # x_ref: (N, C_in) resident; w_ref: (TN, C_in) in PyTorch (C_out, C_in) layout.
    lin = lax.dot_general(
        x_ref[...], w_ref[...],
        dimension_numbers=(((1,), (1,)), ((), ())),
        preferred_element_type=jnp.float32)                          # (N, TN)
    o_ref[...] = _epilogue(lin, p_ref[...])


def linear_block_kernel_k_tiled(x_ref, w_ref, p_ref, o_ref):
    # grid = (j over C_out tiles [parallel], k over C_in tiles [arbitrary]).
    # x_ref: full (N, C_in), VMEM-resident (constant-index BlockSpec).
    # o_ref: (N, TN), constant index across k -> acts as the f32 accumulator.
    k = pl.program_id(1)
    tk = w_ref.shape[1]
    k0 = pl.multiple_of(k * tk, tk)
    xk = x_ref[:, pl.ds(k0, tk)]                                     # (N, TK)

    part = lax.dot_general(
        xk, w_ref[...],
        dimension_numbers=(((1,), (1,)), ((), ())),
        preferred_element_type=jnp.float32)                          # (N, TN)

    @pl.when(k == 0)
    def _():
        o_ref[...] = jnp.zeros_like(o_ref)

    o_ref[...] += part

    @pl.when(k == pl.num_programs(1) - 1)
    def _():
        o_ref[...] = _epilogue(o_ref[...], p_ref[...])


def _pick_tile(dim):
    for t in (512, 256, 128):
        if dim % t == 0:
            return t
    return dim  # small / odd dim: full-extent block (always legal)


def linear_block(x, weight, bias, gamma, beta, *, matmul_dtype=None,
                 tn=None, tk=None, vmem_limit_bytes=None):
    """x: (N, C_in); weight: (C_out, C_in) [PyTorch layout]; bias/gamma/beta: (C_out,).

    matmul_dtype: optional dtype (e.g. jnp.bfloat16) for the MXU inputs; the
    accumulation and the ReLU/BN epilogue stay in f32.  For best HBM usage
    pass the weight already cast to that dtype (no per-call cast then happens).
    """
    n, c_in = x.shape
    c_out, c_in_w = weight.shape
    assert c_in_w == c_in
    assert bias.shape == (c_out,) and gamma.shape == (c_out,) and beta.shape == (c_out,)

    # Cast MXU inputs only if needed (pre-cast bf16 weights pass straight through).
    if matmul_dtype is not None:
        x_mm = x if x.dtype == matmul_dtype else x.astype(matmul_dtype)
        w_mm = weight if weight.dtype == matmul_dtype else weight.astype(matmul_dtype)
    else:
        x_mm, w_mm = x, weight
    x_bytes = jnp.dtype(x_mm.dtype).itemsize
    w_bytes = jnp.dtype(w_mm.dtype).itemsize

    # --- tile selection -----------------------------------------------------
    tn = tn if tn is not None else _pick_tile(c_out)
    assert c_out % tn == 0, "tn must divide C_out"
    # Keep >= 2 output tiles so the "parallel" j axis can shard across both
    # v7x TensorCores (v5e/v6e are single-TC; this costs them nothing).
    while (c_out // tn) < 2 and tn > 128 and tn % 2 == 0 and c_out % (tn // 2) == 0:
        tn //= 2

    if tk is None:
        # Eliminate the reduction grid axis when the full-K weight slab is small.
        tk = c_in if 2 * tn * c_in * w_bytes <= (8 << 20) else _pick_tile(c_in)
    assert c_in % tk == 0, "tk must divide C_in"
    full_k = (tk == c_in)

    # --- VMEM budget (full batch is mandatory for BN correctness) ------------
    # Conservative: count every operand double-buffered.
    est = (2 * n * c_in * x_bytes            # x block (resident; DMA'd once)
           + 2 * tn * tk * w_bytes           # weight tile
           + 2 * 8 * max(tn, 128) * 4        # [bias;gamma;beta], sublane-padded
           + 2 * n * tn * 4)                 # output / accumulator block
    assert est <= VMEM_BUDGET, (
        f"per-step VMEM estimate {est/2**20:.1f} MiB exceeds {VMEM_BUDGET>>20} MiB; "
        "reduce batch size, tk, or tn (batch axis cannot be tiled: BN needs the full batch)")
    vmem_limit = vmem_limit_bytes or VMEM_BUDGET

    # One operand, one DMA for the three per-feature vectors.
    params = jnp.stack([bias, gamma, beta], axis=0).astype(jnp.float32)  # (3, C_out)

    out_shape = jax.ShapeDtypeStruct((n, c_out), jnp.float32)

    if full_k:
        grid_spec = pltpu.PrefetchScalarGridSpec(
            num_scalar_prefetch=0,
            grid=(c_out // tn,),
            in_specs=[
                pl.BlockSpec((n, c_in), lambda j: (0, 0)),   # x resident
                pl.BlockSpec((tn, c_in), lambda j: (j, 0)),  # weight (C_out, C_in)
                pl.BlockSpec((3, tn), lambda j: (0, j)),     # [bias;gamma;beta]
            ],
            out_specs=pl.BlockSpec((n, tn), lambda j: (0, j)),
        )
        kernel = linear_block_kernel_full_k
        semantics = ("parallel",)
    else:
        grid_spec = pltpu.PrefetchScalarGridSpec(
            num_scalar_prefetch=0,
            grid=(c_out // tn, c_in // tk),
            in_specs=[
                pl.BlockSpec((n, c_in), lambda j, k: (0, 0)),   # x resident (DMA once)
                pl.BlockSpec((tn, tk), lambda j, k: (j, k)),    # streaming weight tile
                pl.BlockSpec((3, tn), lambda j, k: (0, j)),
            ],
            out_specs=pl.BlockSpec((n, tn), lambda j, k: (0, j)),  # resident across k
        )
        kernel = linear_block_kernel_k_tiled
        semantics = ("parallel", "arbitrary")

    return pl.pallas_call(
        kernel,
        out_shape=out_shape,
        grid_spec=grid_spec,
        compiler_params=pltpu.CompilerParams(
            dimension_semantics=semantics,
            vmem_limit_bytes=vmem_limit),
    )(x_mm, w_mm, params)


def _reference(x, weight, bias, gamma, beta, matmul_dtype=None):
    """Pure-JAX reference (training-mode BN, biased variance)."""
    if matmul_dtype is not None:
        x = x.astype(matmul_dtype)
        weight = weight.astype(matmul_dtype)
    y = jnp.dot(x, weight.T, preferred_element_type=jnp.float32) + bias
    r = jnp.maximum(y, 0.0)
    m = r.mean(axis=0, keepdims=True)
    v = ((r - m) ** 2).mean(axis=0, keepdims=True)
    return (r - m) * lax.rsqrt(v + BN_EPS) * gamma + beta


if __name__ == "__main__":
    key = jax.random.PRNGKey(0)
    kx, kw, kb, kx2, kw2, kb2 = jax.random.split(key, 6)

    # --- Config A: full-K path (no reduction grid axis), tn auto-split for 2 TCs
    N, C_IN, C_OUT = 128, 256, 512
    x = jax.random.normal(kx, (N, C_IN), dtype=jnp.float32)
    bound = 1.0 / (C_IN ** 0.5)                    # PyTorch nn.Linear init bound
    weight = jax.random.uniform(kw, (C_OUT, C_IN), jnp.float32, -bound, bound)
    bias = jax.random.uniform(kb, (C_OUT,), jnp.float32, -bound, bound)
    gamma = jnp.ones((C_OUT,), jnp.float32)        # BatchNorm1d init
    beta = jnp.zeros((C_OUT,), jnp.float32)

    out = jax.block_until_ready(linear_block(x, weight, bias, gamma, beta))
    ref = _reference(x, weight, bias, gamma, beta)
    assert jnp.allclose(out, ref, atol=5e-3, rtol=5e-3), "config A (f32) mismatch"

    # bf16-MXU fast path with a PRE-CAST weight (no per-call cast in the wrapper).
    w_bf16 = weight.astype(jnp.bfloat16)
    out_bf16 = jax.block_until_ready(
        linear_block(x, w_bf16, bias, gamma, beta, matmul_dtype=jnp.bfloat16))
    ref_bf16 = _reference(x, weight, bias, gamma, beta, matmul_dtype=jnp.bfloat16)
    assert jnp.allclose(out_bf16, ref_bf16, atol=5e-2, rtol=5e-2), "config A (bf16) mismatch"

    # --- Config B: forced K-tiled reduction path (resident x + resident output acc)
    N2, C_IN2, C_OUT2 = 64, 512, 384
    x2 = jax.random.normal(kx2, (N2, C_IN2), dtype=jnp.float32)
    bound2 = 1.0 / (C_IN2 ** 0.5)
    weight2 = jax.random.uniform(kw2, (C_OUT2, C_IN2), jnp.float32, -bound2, bound2)
    bias2 = jax.random.uniform(kb2, (C_OUT2,), jnp.float32, -bound2, bound2)
    gamma2 = jnp.ones((C_OUT2,), jnp.float32)
    beta2 = jnp.zeros((C_OUT2,), jnp.float32)

    out2 = jax.block_until_ready(
        linear_block(x2, weight2, bias2, gamma2, beta2, tn=128, tk=256))
    ref2 = _reference(x2, weight2, bias2, gamma2, beta2)
    assert jnp.allclose(out2, ref2, atol=5e-3, rtol=5e-3), "config B (k-tiled) mismatch"

    # TODO(synk): BatchNorm1d running_mean/running_var buffer updates (module
    # state mutation) are not produced; only the forward output is computed.
    print("KERNEL_OK")
</pallas_src>

<mosaic_0001>
module attributes {stable_mosaic.version = 11 : i64} {
  func.func @linear_block_kernel_full_k(%arg0: i32, %arg1: memref<128x256xf32, #tpu.memory_space<vmem>>, %arg2: memref<256x256xf32, #tpu.memory_space<vmem>>, %arg3: memref<3x256xf32, #tpu.memory_space<vmem>>, %arg4: memref<128x256xf32, #tpu.memory_space<vmem>>) attributes {dimension_semantics = [#tpu.dimension_semantics<parallel>], iteration_bounds = array<i64: 2>, scalar_prefetch = 0 : i64, scratch_operands = 0 : i64, tpu.core_type = #tpu.core_type<tc>, window_params = [{pipeline_mode = #tpu.pipeline_mode<synchronous>, transform_indices = @transform_0, window_bounds = array<i64: 128, 256>}, {transform_indices = @transform_1, window_bounds = array<i64: 256, 256>}, {transform_indices = @transform_2, window_bounds = array<i64: 3, 256>}, {transform_indices = @transform_3, window_bounds = array<i64: 128, 256>}]} {
    %c0 = arith.constant 0 : index
    %c0_0 = arith.constant 0 : index
    %0 = vector.load %arg1[%c0, %c0_0] : memref<128x256xf32, #tpu.memory_space<vmem>>, vector<128x256xf32>
    %c0_1 = arith.constant 0 : index
    %c0_2 = arith.constant 0 : index
    %1 = vector.load %arg2[%c0_1, %c0_2] : memref<256x256xf32, #tpu.memory_space<vmem>>, vector<256x256xf32>
    %cst = arith.constant dense<0.000000e+00> : vector<128x256xf32>
    %2 = tpu.matmul %0, %1, %cst {dimension_numbers = #tpu.dot_dimension_numbers<[1], [1], [0], [0], [0, 0, 1, 0], [], []>} : vector<128x256xf32>, vector<256x256xf32>, vector<128x256xf32> -> vector<128x256xf32>
    %c0_3 = arith.constant 0 : index
    %c0_4 = arith.constant 0 : index
    %3 = vector.load %arg3[%c0_3, %c0_4] : memref<3x256xf32, #tpu.memory_space<vmem>>, vector<3x256xf32>
    %4 = vector.extract_strided_slice %3 {offsets = [0, 0], sizes = [1, 256], strides = [1, 1]} : vector<3x256xf32> to vector<1x256xf32>
    %5 = vector.extract_strided_slice %3 {offsets = [1, 0], sizes = [1, 256], strides = [1, 1]} : vector<3x256xf32> to vector<1x256xf32>
    %6 = vector.extract_strided_slice %3 {offsets = [2, 0], sizes = [1, 256], strides = [1, 1]} : vector<3x256xf32> to vector<1x256xf32>
    %7 = vector.broadcast %4 : vector<1x256xf32> to vector<128x256xf32>
    %8 = arith.addf %2, %7 : vector<128x256xf32>
    %cst_5 = arith.constant 0.000000e+00 : f32
    %9 = vector.broadcast %cst_5 : f32 to vector<128x256xf32>
    %10 = arith.maximumf %8, %9 : vector<128x256xf32>
    %cst_6 = arith.constant dense<0.000000e+00> : vector<256xf32>
    %11 = vector.multi_reduction <add>, %10, %cst_6 [0] : vector<128x256xf32> to vector<256xf32>
    %12 = vector.shape_cast %11 : vector<256xf32> to vector<1x256xf32>
    %cst_7 = arith.constant 1.280000e+02 : f32
    %13 = vector.broadcast %cst_7 : f32 to vector<1x256xf32>
    %14 = arith.divf %12, %13 : vector<1x256xf32>
    %15 = vector.broadcast %14 : vector<1x256xf32> to vector<128x256xf32>
    %16 = arith.subf %10, %15 : vector<128x256xf32>
    %17 = vector.broadcast %14 : vector<1x256xf32> to vector<128x256xf32>
    %18 = arith.subf %10, %17 : vector<128x256xf32>
    %19 = arith.mulf %16, %18 : vector<128x256xf32>
    %cst_8 = arith.constant dense<0.000000e+00> : vector<256xf32>
    %20 = vector.multi_reduction <add>, %19, %cst_8 [0] : vector<128x256xf32> to vector<256xf32>
    %21 = vector.shape_cast %20 : vector<256xf32> to vector<1x256xf32>
    %cst_9 = arith.constant 1.280000e+02 : f32
    %22 = vector.broadcast %cst_9 : f32 to vector<1x256xf32>
    %23 = arith.divf %21, %22 : vector<1x256xf32>
    %cst_10 = arith.constant 9.99999974E-6 : f32
    %24 = vector.broadcast %cst_10 : f32 to vector<1x256xf32>
    %25 = arith.addf %23, %24 : vector<1x256xf32>
    %26 = math.rsqrt %25 : vector<1x256xf32>
    %27 = arith.mulf %5, %26 : vector<1x256xf32>
    %28 = arith.mulf %14, %27 : vector<1x256xf32>
    %29 = arith.subf %6, %28 : vector<1x256xf32>
    %30 = vector.broadcast %27 : vector<1x256xf32> to vector<128x256xf32>
    %31 = arith.mulf %10, %30 : vector<128x256xf32>
    %32 = vector.broadcast %29 : vector<1x256xf32> to vector<128x256xf32>
    %33 = arith.addf %31, %32 : vector<128x256xf32>
    %c0_11 = arith.constant 0 : index
    %c0_12 = arith.constant 0 : index
    %34 = vector.load %arg4[%c0_11, %c0_12] : memref<128x256xf32, #tpu.memory_space<vmem>>, vector<128x256xf32>
    tpu.vector_store %arg4[%c0_11, %c0_12], %33 {strides = array<i32>} : memref<128x256xf32, #tpu.memory_space<vmem>>, vector<128x256xf32>,
    return
  }
  func.func @transform_0(%arg0: i32) -> (i32, i32) {
    %c0_i32 = arith.constant 0 : i32
    %c0_i32_0 = arith.constant 0 : i32
    %c0_i32_1 = arith.constant 0 : i32
    return %c0_i32, %c0_i32_0 : i32, i32
  }
  func.func @transform_1(%arg0: i32) -> (i32, i32) {
    %c0_i32 = arith.constant 0 : i32
    %c0_i32_0 = arith.constant 0 : i32
    return %arg0, %c0_i32 : i32, i32
  }
  func.func @transform_2(%arg0: i32) -> (i32, i32) {
    %c0_i32 = arith.constant 0 : i32
    %c0_i32_0 = arith.constant 0 : i32
    return %c0_i32, %arg0 : i32, i32
  }
  func.func @transform_3(%arg0: i32) -> (i32, i32) {
    %c0_i32 = arith.constant 0 : i32
    %c0_i32_0 = arith.constant 0 : i32
    return %c0_i32, %arg0 : i32, i32
  }
}

</mosaic_0001>

<bundles_post_ra>
// kernel: tpu_custom_call.1
= control target key start
LH: loop header
LB: loop body
LE: loop exit
PB: predicated region body
PF: predicated region fallthrough
CT: control target
= control target key end

     0   :  { %8 = vsyncpa [#allocation3], 0  ;;  %s1928_s0 = inlined_call_operand.hbm [shape: f32[128,256], index: 0, kind: input, shape index: {}]   ;;  %s1929_s1 = inlined_call_operand.hbm [shape: f32[512,256], index: 1, kind: input, shape index: {}]   ;;  %s1930_s2 = inlined_call_operand.hbm [shape: f32[3,512], index: 2, kind: input, shape index: {}]   ;;  %s1931_s3 = inlined_call_operand.hbm [shape: f32[128,512], index: 3, kind: output, shape index: {}]  }
   0x1   :  { %9 = vsyncpa [#allocation6], 0 }
   0x2   :  { %11 = vsyncpa [#allocation6 + $0x1], 0 }
   0x3   :  { %12 = vsyncpa [#allocation4], 0 }
   0x4   :  { %14 = vsyncpa [#allocation4 + $0x1], 0  ;;  %s1317_s12 = smov 0   ;;  %s1319_s13 = smov 0  }
   0x5   :  { %s1321_s14 = smov 0   ;;  %s1323_s15 = smov 0  }
   0x6 LB: > { %s1338_s16 = sadd.s32 1, %s1286_s15   ;;  %s48_s17 = sadd.s32 1, %s1282_s14  ;;  %s1286_s15 = sphi %s1323_s15, %s1956_s15   ;;  %s1282_s14 = sphi %s1321_s14, %s1955_s14   ;;  %s1278_s13 = sphi %s1319_s13, %s1954_s13   ;;  %s1274_s12 = sphi %s1317_s12, %s1953_s12  }
   0x7   : > { %s45_s18 = ssub.s32 %s1286_s15, %s1338_s16  ;;  %p55_p0 = scmp.ne.s32.totalorder %s1282_s14, %s1278_s13 }
   0x8   : > { %p46_p1 = scmp.eq.s32.totalorder %s45_s18, 0  ;;  %p56_p2 = scmp.eq.s32.totalorder %s1286_s15, 0 }
   0x9   : > { %p1091_p5 = scmp.lt.s32.totalorder %s1286_s15, 2  ;;  %s150_s20 = sand.u32 1, %s1286_s15  }
   0xa   : > { %s1347_s19 = scalar_select %p46_p1, %s1282_s14, %s48_s17  }
   0xb   : > { %p57_p3 = por %p56_p2, %p55_p0  ;;  %s152_s21 = sand.u32 1, %s1282_s14  }
   0xc   : > { %s980_s22 = sshll.u32 %s152_s21, 9  ;;  %s998_s23 = sshll.u32 %s1286_s15, 13 }
   0xd   : > { %s1362_s26 = scalar_lea.hbm %s1929_s1, %s998_s23  ;;  %s154_s27 = scalar_lea.vmem [#allocation5], %s980_s22 }
   0xe   : > { %s162_s28 = sshll.u32 %s154_s27, 4  ;;  %p1364_p6 = pnand %p1091_p5, %p57_p3  ;;  %s1368_s28 = int_to_ptr.vmem [resolvable:$true] %s162_s28 }
   0xf   : > { %s1370_s30 = scalar_lea.sflag [#allocation6], %s150_s20  ;;  %s1136_s4 = scalar_lea.hbm %s1362_s26, 8192 }
  0x10   : > { %p1137_p7 = scmp.ne.s32.totalorder %s1362_s26, %s1136_s4  ;;  %p1138_p8 = pneg %p1364_p6 }
  0x11   : > { %s1141_s7 = scalar_lea.hbm %s1929_s1, 16384  ;;  %p1142_p11 = scmp.lt.s32.totalorder %s1362_s26, %s1929_s1 }
  0x12   : > { %p1139_p9 = pnand %p1138_p8, %p1137_p7  ;;  %p1143_p12 = scmp.lt.s32.totalorder %s1141_s7, %s1136_s4 }
  0x14   : > { %p1140_p10 = pneg %p1139_p9  ;;  %p1144_p13 = por %p1143_p12, %p1142_p11 }
  0x16   : > { %p1145_p1 = pnand %p1144_p13, %p1140_p10 }
  0x18   : > { %1148 = shalt.err (!%p1145_p1)
}
  0x19   : > { %s1149_s10 = scalar_lea.vmem %s1368_s28, 8192  ;;  %s1288_s11 = smov [#allocation5]  }
  0x1a   : > { %p1150_p2 = scmp.ne.s32.totalorder %s1368_s28, %s1149_s10  ;;  %s1154_s17 = sshll.u32 %s1288_s11, 4  ;;  %s1155_s17 = int_to_ptr.vmem [resolvable:$false] %s1154_s17 }
  0x1b   : > { %s1156_s18 = scalar_lea.vmem %s1155_s17, 16384  ;;  %p1157_p7 = scmp.lt.s32.totalorder %s1368_s28, %s1155_s17 }
  0x1c   : > { %p1152_p3 = pnand %p1150_p2, %p1138_p8  ;;  %p1158_p9 = scmp.lt.s32.totalorder %s1156_s18, %s1149_s10 }
  0x1e   : > { %p1153_p5 = pneg %p1152_p3  ;;  %p1159_p4 = por %p1158_p9, %p1157_p7 }
  0x20   : > { %p1160_p11 = pnand %p1159_p4, %p1153_p5 }
  0x22   : > { %1163 = shalt.err (!%p1160_p11)
}
  0x23   : > { %s1934_s20 = smov 256   ;;  %s1290_s22 = smov 16  }
  0x24   : > { %1082 = dma.hbm_to_vmem [thread:$0]  (!%p1364_p6), %s1362_s26, 8192, %s1368_s28, %s1370_s30, %s1934_s20, %s1934_s20, %s1290_s22  }
  0x25   : > { %s1401_s23 = sadd.s32 4294967295, %s1286_s15   ;;  %s976_s24 = sadd.s32 4294967294, %s1286_s15  }
  0x26   : > { %p61_p4 = scmp.ne.s32.totalorder %s1278_s13, %s1274_s12  ;;  %p1932_p10 = scmp.eq.s32.totalorder %s1401_s23, 0 }
  0x27   : > { %p111_p12 = scmp.eq.s32.totalorder %s1401_s23, 1  ;;  %p117_p13 = scmp.eq.s32.totalorder %s976_s24, 1 }
  0x28   : > { %p1410_p1 = por %p1932_p10, %p61_p4  ;;  %p977_p2 = scmp.ge.s32.totalorder %s1286_s15, 1 }
  0x29   : > { %p1418_p3 = por %p111_p12, %p55_p0  ;;  %p1422_p5 = por %p117_p13, %p61_p4 }
  0x2a   : > { %s1939_s25 = scalar_select %p1410_p1, 1, 0 }
  0x2b   : > { %s1940_s26 = scalar_select %p1418_p3, 1, 0 }
  0x2c   : > { %s1941_s27 = scalar_select %p1422_p5, 1, 0 }
  0x2d   : > { %p124_p7 = scmp.lt.s32.totalorder %s1286_s15, 3  ;;  %s984_s28 = sshll.u32 %s152_s21, 3 }
  0x2e   : > { %s1291_s5 = smov [#allocation2]   ;;  %s999_s7 = sshll.u32 %s1286_s15, 7 }
  0x2f   : > { %p1429_p9 = pnand %p977_p2, %p124_p7  ;;  %s136_s6 = sshll.u32 %s1291_s5, 4  ;;  %s1433_s6 = int_to_ptr.vmem [resolvable:$true] %s136_s6 }
  0x30   : > { %s1441_s10 = scalar_lea.hbm %s1930_s2, %s999_s7  ;;  %s176_s21 = scalar_lea.vmem [#allocation7], %s984_s28 }
  0x31   : > { %s1942_s4 = scalar_select %p1429_p9, 1, 0 }
  0x32   : > { %p1075_p0 = pneg %p1429_p9  ;;  %s184_s11 = sshll.u32 %s176_s21, 4  ;;  %s185_s11 = int_to_ptr.vmem [resolvable:$true] %s184_s11 }
  0x33   : > { %s1164_s18 = scalar_lea.hbm %s1441_s10, 128  ;;  %s1169_s7 = scalar_lea.hbm %s1930_s2, 256 }
  0x34   : > { %p1445_p11 = pnand %p1075_p0, %p1932_p10  ;;  %p1165_p4 = scmp.ne.s32.totalorder %s1441_s10, %s1164_s18 }
  0x35   : > { %p1170_p2 = scmp.lt.s32.totalorder %s1441_s10, %s1930_s2  ;;  %p1171_p7 = scmp.lt.s32.totalorder %s1169_s7, %s1164_s18 }
  0x36   : > { %s1943_s17 = scalar_select %p1445_p11, 1, 0 }
  0x37   : > { %p1167_p12 = pnand %p1165_p4, %p1138_p8  ;;  %p1172_p0 = por %p1171_p7, %p1170_p2 }
  0x39   : > { %p1168_p13 = pneg %p1167_p12 }
  0x3b   : > { %p1173_p10 = pnand %p1172_p0, %p1168_p13 }
  0x3d   : > { %1176 = shalt.err (!%p1173_p10)
}
  0x3e   : > { %s1177_s28 = scalar_lea.vmem %s185_s11, 128  ;;  %s1292_s21 = smov [#allocation7]  }
  0x3f   : > { %p1178_p5 = scmp.ne.s32.totalorder %s185_s11, %s1177_s28  ;;  %s1182_s20 = sshll.u32 %s1292_s21, 4  ;;  %s1183_s20 = int_to_ptr.vmem [resolvable:$false] %s1182_s20 }
  0x40   : > { %s1184_s24 = scalar_lea.vmem %s1183_s20, 256  ;;  %p1185_p12 = scmp.lt.s32.totalorder %s185_s11, %s1183_s20 }
  0x41   : > { %p1180_p3 = pnand %p1178_p5, %p1138_p8  ;;  %p1186_p1 = scmp.lt.s32.totalorder %s1184_s24, %s1177_s28 }
  0x43   : > { %p1181_p4 = pneg %p1180_p3  ;;  %p1187_p9 = por %p1186_p1, %p1185_p12 }
  0x45   : > { %p1188_p11 = pnand %p1187_p9, %p1181_p4 }
  0x47   : > { %1191 = shalt.err (!%p1188_p11)
}
  0x48   : > { %1085 = dma.hbm_to_vmem [thread:$0]  (!%p1364_p6), %s1441_s10, 128, %s185_s11, %s1370_s30  }
  0x49   : > { %p1944_p8 = scmp.ne.s32.totalorder %s1943_s17, 0  ;;  %s1203_s18 = scalar_lea.vmem %s1433_s6, 4096 }
  0x4a   : > { %p1204_p3 = scmp.ne.s32.totalorder %s1433_s6, %s1203_s18  ;;  %p1211_p2 = scmp.lt.s32.totalorder %s1433_s6, %s1433_s6 }
  0x4b   : > { %p1194_p10 = pneg %p1944_p8  ;;  %p1212_p1 = scmp.lt.s32.totalorder %s1203_s18, %s1203_s18 }
  0x4d   : > { %p1206_p5 = pnand %p1204_p3, %p1194_p10  ;;  %p1213_p9 = por %p1212_p1, %p1211_p2 }
  0x4f   : > { %p1207_p13 = pneg %p1206_p5 }
  0x51   : > { %p1214_p11 = pnand %p1213_p9, %p1207_p13 }
  0x53   : > { %1217 = shalt.err (!%p1214_p11)
}
  0x54   : > { %s1945_s29 = smov 256   ;;  %p1946_p6 = scmp.ne.s32.totalorder %s1942_s4, 0 }
  0x55   : > { %1078 = dma.hbm_to_vmem [thread:$0]  (!%p1944_p8), %s1928_s0, 4096, %s1433_s6, [#allocation3], %s1945_s29, %s1945_s29, %s1290_s22  }
  0x56   : > { %193 = sbr.rel (%p1946_p6) target bundleno = 604 (0x25c), region = 32  ;;  %p1947_p7 = scmp.eq.s32.totalorder (!%p1946_p6), %s1401_s23, 0 }
  0x5b   : > { %1261 = dma.done.wait (%p1947_p7), [#allocation3], 4096   ;;  %p1948_p0 = pmov %p1947_p7 }
  0x5c   : > { %s199_s10 = sand.u32 1, %s1401_s23   ;;  %s1491_s11 = sand.u32 1, %s1278_s13  }
  0x5d   : > { %1263 = vsyncadd (%p1948_p0), [#allocation3], 4294963200  ;;  %s989_s17 = sshll.u32 %s1491_s11, 9  ;;  %s200_s5 = scalar_lea.sflag [#allocation6], %s199_s10 }
  0x5e   : > { %s1494_s7 = scalar_lea.vmem [#allocation5], %s989_s17  ;;  %p1949_p4 = scmp.ne.s32.totalorder %s1939_s25, 0 }
  0x60   : > { %1265 = dma.done.wait (%p1949_p4), %s200_s5, 8320  }
  0x61   : > { %1267 = vsyncadd (%p1949_p4), %s200_s5, 4294958976  ;;  %v306_v0 = vld [vmem:[%s1494_s7 + $0xf8] sm:$0xff]  ;;  %v305_v1 = vld [vmem:[%s1494_s7 + $0xf0] sm:$0xff]  ;;  %s990_s22 = sshll.u32 %s1491_s11, 3  ;;  %s991_s4 = sshll.u32 %s1491_s11, 8 }
  0x62   : > { %v304_v2 = vld [vmem:[%s1494_s7 + $0xe8] sm:$0xff]  ;;  %359 = vmatprep.subr.mxu0 %v306_v0  ;;  %1001 = vmatprep.subr.mxu1 %v306_v0  ;;  %v303_v3 = vld [vmem:[%s1494_s7 + $0xe0] sm:$0xff]  ;;  %v302_v4 = vld [vmem:[%s1494_s7 + $0xd8] sm:$0xff]  ;;  %s212_s25 = scalar_lea.vmem [#allocation7], %s990_s22  ;;  %s1844_s6 = scalar_lea.vmem [#allocation8], %s991_s4 }
  0x63   : > { %360 = vmatpush1.xpose.msra.mxu0 %v305_v1  ;;  %1033 = vmatpush1.xpose.msra.mxu1 %v305_v1  ;;  %v301_v5 = vld [vmem:[%s1494_s7 + $0xd0] sm:$0xff]  ;;  %v300_v6 = vld [vmem:[%s1494_s7 + $0xc8] sm:$0xff]  ;;  %v299_v7 = vld [vmem:[%s1494_s7 + $0xc0] sm:$0xff]  ;;  %s1000_s8 = sshll.u32 %s1401_s23, 8  ;;  %s871_s9 = sshll.u32 %s1844_s6, 4  ;;  %s1873_s9 = int_to_ptr.vmem [resolvable:$true] %s871_s9 }
  0x64   : > { %361 = vmatprep.subr.mxu0 %v304_v2  ;;  %1002 = vmatprep.subr.mxu1 %v304_v2  ;;  %v298_v8 = vld [vmem:[%s1494_s7 + $0xb8] sm:$0xff]  ;;  %v297_v9 = vld [vmem:[%s1494_s7 + $0xb0] sm:$0xff]  ;;  %v296_v10 = vld [vmem:[%s1494_s7 + $0xa8] sm:$0xff]  ;;  %s1867_s21 = scalar_lea.hbm %s1931_s3, %s1000_s8  ;;  %s858_s24 = scalar_lea.sflag [#allocation4], %s1491_s11 }
  0x65   : > { %v295_v11 = vld [vmem:[%s1494_s7 + $0xa0] sm:$0xff]  ;;  %v294_v12 = vld [vmem:[%s1494_s7 + $0x98] sm:$0xff]  ;;  %v244_v13 = vld [vmem:[#allocation2 + $0x8] sm:$0xff]  ;;  %s1218_s18 = scalar_lea.vmem %s1873_s9, 4096  ;;  %p1950_p8 = scmp.ne.s32.totalorder %s1940_s26, 0 }
  0x66   : > { %v293_v14 = vld [vmem:[%s1494_s7 + $0x90] sm:$0xff]  ;;  %v292_v15 = vld [vmem:[%s1494_s7 + $0x88] sm:$0xff]  ;;  %423 = vmatprep.mubr.f32.mxu0 %v244_v13  ;;  %v291_v17 = vld [vmem:[%s1494_s7 + $0x80] sm:$0xff]  ;;  %p1219_p12 = scmp.ne.s32.totalorder %s1873_s9, %s1218_s18  ;;  %s1293_s29 = smov [#allocation8]  }
  0x67   : > { %362 = vmatpush1.xpose.msra.mxu0 %v303_v3  ;;  %1034 = vmatpush1.xpose.msra.mxu1 %v303_v3  ;;  %v260_v16 = vld [vmem:[#allocation2 + $0x88] sm:$0xff]  ;;  %v290_v18 = vld [vmem:[%s1494_s7 + $0x78] sm:$0xff]  ;;  %v289_v19 = vld [vmem:[%s1494_s7 + $0x70] sm:$0xff]  ;;  %s1222_s20 = sshll.u32 %s1293_s29, 4  ;;  %s1223_s20 = int_to_ptr.vmem [resolvable:$false] %s1222_s20 }
  0x68   : > { %363 = vmatprep.subr.mxu0 %v302_v4  ;;  %1003 = vmatprep.subr.mxu1 %v302_v4  ;;  %v288_v20 = vld [vmem:[%s1494_s7 + $0x68] sm:$0xff]  ;;  %v287_v21 = vld [vmem:[%s1494_s7 + $0x60] sm:$0xff]  ;;  %v286_v22 = vld [vmem:[%s1494_s7 + $0x58] sm:$0xff]  ;;  %p1220_p10 = pnand %p1219_p12, %p1950_p8  ;;  %s1224_s30 = scalar_lea.vmem %s1223_s20, 8192 }
  0x69   : > { %471 = vmatprep.mubr.f32.mxu1 %v260_v16  ;;  %v285_v23 = vld [vmem:[%s1494_s7 + $0x50] sm:$0xff]  ;;  %v284_v24 = vld [vmem:[%s1494_s7 + $0x48] sm:$0xff]  ;;  %v283_v25 = vld [vmem:[%s1494_s7 + $0x40] sm:$0xff]  ;;  %p1225_p5 = scmp.lt.s32.totalorder %s1873_s9, %s1223_s20  ;;  %p1226_p13 = scmp.lt.s32.totalorder %s1224_s30, %s1218_s18 }
  0x6a   : > { %v282_v26 = vld [vmem:[%s1494_s7 + $0x38] sm:$0xff]  ;;  %v281_v27 = vld [vmem:[%s1494_s7 + $0x30] sm:$0xff]  ;;  %v280_v28 = vld [vmem:[%s1494_s7 + $0x28] sm:$0xff]  ;;  %p1221_p3 = pneg %p1220_p10 }
  0x6b   : > { %364 = vmatpush1.xpose.msra.mxu0 %v301_v5  ;;  %1035 = vmatpush1.xpose.msra.mxu1 %v301_v5  ;;  %v279_v29 = vld [vmem:[%s1494_s7 + $0x20] sm:$0xff]  ;;  %v278_v30 = vld [vmem:[%s1494_s7 + $0x18] sm:$0xff]  ;;  %v277_v31 = vld [vmem:[%s1494_s7 + $0x10] sm:$0xff]  ;;  %p1227_p2 = por %p1226_p13, %p1225_p5 }
  0x6c   : > { %365 = vmatprep.subr.mxu0 %v300_v6  ;;  %1004 = vmatprep.subr.mxu1 %v300_v6  ;;  %v276_v32 = vld [vmem:[%s1494_s7 + $0x8] sm:$0xff]  ;;  %v275_v33 = vld [vmem:[%s1494_s7] sm:$0xff]  ;;  %v338_v34 = vld [vmem:[%s1494_s7 + $0x1f8] sm:$0xff] }
  0x6d   : > { %v337_v35 = vld [vmem:[%s1494_s7 + $0x1f0] sm:$0xff]  ;;  %v336_v36 = vld [vmem:[%s1494_s7 + $0x1e8] sm:$0xff]  ;;  %v335_v37 = vld [vmem:[%s1494_s7 + $0x1e0] sm:$0xff]  ;;  %p1228_p1 = pnand %p1227_p2, %p1221_p3 }
  0x6e   : > { %v334_v38 = vld [vmem:[%s1494_s7 + $0x1d8] sm:$0xff]  ;;  %v333_v39 = vld [vmem:[%s1494_s7 + $0x1d0] sm:$0xff]  ;;  %v332_v40 = vld [vmem:[%s1494_s7 + $0x1c8] sm:$0xff] }
  0x6f   : > { %366 = vmatpush1.xpose.msra.mxu0 %v299_v7  ;;  %1036 = vmatpush1.xpose.msra.mxu1 %v299_v7  ;;  %v331_v41 = vld [vmem:[%s1494_s7 + $0x1c0] sm:$0xff]  ;;  %v330_v42 = vld [vmem:[%s1494_s7 + $0x1b8] sm:$0xff]  ;;  %v329_v43 = vld [vmem:[%s1494_s7 + $0x1b0] sm:$0xff] }
  0x70   : > { %367 = vmatprep.subr.mxu0 %v298_v8  ;;  %1005 = vmatprep.subr.mxu1 %v298_v8  ;;  %v328_v44 = vld [vmem:[%s1494_s7 + $0x1a8] sm:$0xff]  ;;  %v327_v45 = vld [vmem:[%s1494_s7 + $0x1a0] sm:$0xff]  ;;  %v326_v46 = vld [vmem:[%s1494_s7 + $0x198] sm:$0xff] }
  0x71   : > { %v325_v47 = vld [vmem:[%s1494_s7 + $0x190] sm:$0xff]  ;;  %v324_v48 = vld [vmem:[%s1494_s7 + $0x188] sm:$0xff]  ;;  %v323_v49 = vld [vmem:[%s1494_s7 + $0x180] sm:$0xff] }
  0x72   : > { %v322_v50 = vld [vmem:[%s1494_s7 + $0x178] sm:$0xff]  ;;  %v321_v51 = vld [vmem:[%s1494_s7 + $0x170] sm:$0xff]  ;;  %v320_v52 = vld [vmem:[%s1494_s7 + $0x168] sm:$0xff] }
  0x73   : > { %368 = vmatpush1.xpose.msra.mxu0 %v297_v9  ;;  %1037 = vmatpush1.xpose.msra.mxu1 %v297_v9  ;;  %v319_v53 = vld [vmem:[%s1494_s7 + $0x160] sm:$0xff]  ;;  %v318_v54 = vld [vmem:[%s1494_s7 + $0x158] sm:$0xff]  ;;  %v317_v55 = vld [vmem:[%s1494_s7 + $0x150] sm:$0xff] }
  0x74   : > { %369 = vmatprep.subr.mxu0 %v296_v10  ;;  %1006 = vmatprep.subr.mxu1 %v296_v10  ;;  %v316_v56 = vld [vmem:[%s1494_s7 + $0x148] sm:$0xff]  ;;  %v315_v57 = vld [vmem:[%s1494_s7 + $0x140] sm:$0xff]  ;;  %v314_v58 = vld [vmem:[%s1494_s7 + $0x138] sm:$0xff] }
  0x75   : > { %v313_v59 = vld [vmem:[%s1494_s7 + $0x130] sm:$0xff]  ;;  %v312_v60 = vld [vmem:[%s1494_s7 + $0x128] sm:$0xff]  ;;  %v311_v61 = vld [vmem:[%s1494_s7 + $0x120] sm:$0xff] }
  0x76   : > { %v310_v62 = vld [vmem:[%s1494_s7 + $0x118] sm:$0xff]  ;;  %v309_v63 = vld [vmem:[%s1494_s7 + $0x110] sm:$0xff]  ;;  %v308_v0 = vld [vmem:[%s1494_s7 + $0x108] sm:$0xff] }
  0x77   : > { %370 = vmatpush1.xpose.msra.mxu0 %v295_v11  ;;  %1038 = vmatpush1.xpose.msra.mxu1 %v295_v11  ;;  %v307_v1 = vld [vmem:[%s1494_s7 + $0x100] sm:$0xff]  ;;  %v246_v4 = vld [vmem:[#allocation2 + $0x18] sm:$0xff]  ;;  %v245_v6 = vld [vmem:[#allocation2 + $0x10] sm:$0xff] }
  0x78   : > { %371 = vmatprep.subr.mxu0 %v294_v12  ;;  %1007 = vmatprep.subr.mxu1 %v294_v12  ;;  %v243_v2 = vld [vmem:[#allocation2] sm:$0xff]  ;;  %v262_v5 = vld [vmem:[#allocation2 + $0x98] sm:$0xff]  ;;  %v261_v7 = vld [vmem:[#allocation2 + $0x90] sm:$0xff] }
  0x79   : > { %v259_v3 = vld [vmem:[#allocation2 + $0x80] sm:$0xff]  ;;  %v248_v8 = vld [vmem:[#allocation2 + $0x28] sm:$0xff]  ;;  %v250_v12 = vld [vmem:[#allocation2 + $0x38] sm:$0xff] }
  0x7a   : > { %v264_v9 = vld [vmem:[#allocation2 + $0xa8] sm:$0xff]  ;;  %v247_v10 = vld [vmem:[#allocation2 + $0x20] sm:$0xff]  ;;  %v266_v13 = vld [vmem:[#allocation2 + $0xb8] sm:$0xff] }
  0x7b   : > { %372 = vmatpush1.xpose.msra.mxu0 %v293_v14  ;;  %1039 = vmatpush1.xpose.msra.mxu1 %v293_v14  ;;  %v263_v11 = vld [vmem:[#allocation2 + $0xa0] sm:$0xff]  ;;  %v249_v14 = vld [vmem:[#allocation2 + $0x30] sm:$0xff]  ;;  %v252_v16 = vld [vmem:[#allocation2 + $0x48] sm:$0xff] }
  0x7c   : > { %373 = vmatprep.subr.mxu0 %v292_v15  ;;  %1008 = vmatprep.subr.mxu1 %v292_v15  ;;  %v265_v15 = vld [vmem:[#allocation2 + $0xb0] sm:$0xff] }
  0x7f   : > { %374 = vmatpush1.xpose.msra.mxu0 %v291_v17  ;;  %1040 = vmatpush1.xpose.msra.mxu1 %v291_v17  ;;  %v268_v17 = vld [vmem:[#allocation2 + $0xc8] sm:$0xff] }
  0x80   : > { %375 = vmatprep.subr.mxu0 %v290_v18  ;;  %1009 = vmatprep.subr.mxu1 %v290_v18  ;;  %v251_v18 = vld [vmem:[#allocation2 + $0x40] sm:$0xff] }
  0x83   : > { %376 = vmatpush1.xpose.msra.mxu0 %v289_v19  ;;  %1041 = vmatpush1.xpose.msra.mxu1 %v289_v19  ;;  %v267_v19 = vld [vmem:[#allocation2 + $0xc0] sm:$0xff] }
  0x84   : > { %377 = vmatprep.subr.mxu0 %v288_v20  ;;  %1010 = vmatprep.subr.mxu1 %v288_v20  ;;  %v254_v20 = vld [vmem:[#allocation2 + $0x58] sm:$0xff] }
  0x87   : > { %378 = vmatpush1.xpose.msra.mxu0 %v287_v21  ;;  %1042 = vmatpush1.xpose.msra.mxu1 %v287_v21  ;;  %v270_v21 = vld [vmem:[#allocation2 + $0xd8] sm:$0xff] }
  0x88   : > { %379 = vmatprep.subr.mxu0 %v286_v22  ;;  %1011 = vmatprep.subr.mxu1 %v286_v22  ;;  %v253_v22 = vld [vmem:[#allocation2 + $0x50] sm:$0xff] }
  0x8b   : > { %380 = vmatpush1.xpose.msra.mxu0 %v285_v23  ;;  %1043 = vmatpush1.xpose.msra.mxu1 %v285_v23  ;;  %v269_v23 = vld [vmem:[#allocation2 + $0xd0] sm:$0xff] }
  0x8c   : > { %381 = vmatprep.subr.mxu0 %v284_v24  ;;  %1012 = vmatprep.subr.mxu1 %v284_v24  ;;  %v256_v24 = vld [vmem:[#allocation2 + $0x68] sm:$0xff] }
  0x8f   : > { %382 = vmatpush1.xpose.msra.mxu0 %v283_v25  ;;  %1044 = vmatpush1.xpose.msra.mxu1 %v283_v25  ;;  %v272_v25 = vld [vmem:[#allocation2 + $0xe8] sm:$0xff] }
  0x90   : > { %383 = vmatprep.subr.mxu0 %v282_v26  ;;  %1013 = vmatprep.subr.mxu1 %v282_v26  ;;  %v255_v26 = vld [vmem:[#allocation2 + $0x60] sm:$0xff] }
  0x93   : > { %384 = vmatpush1.xpose.msra.mxu0 %v281_v27  ;;  %1045 = vmatpush1.xpose.msra.mxu1 %v281_v27  ;;  %v271_v27 = vld [vmem:[#allocation2 + $0xe0] sm:$0xff] }
  0x94   : > { %385 = vmatprep.subr.mxu0 %v280_v28  ;;  %1014 = vmatprep.subr.mxu1 %v280_v28  ;;  %v258_v28 = vld [vmem:[#allocation2 + $0x78] sm:$0xff] }
  0x97   : > { %386 = vmatpush1.xpose.msra.mxu0 %v279_v29  ;;  %1046 = vmatpush1.xpose.msra.mxu1 %v279_v29  ;;  %v274_v29 = vld [vmem:[#allocation2 + $0xf8] sm:$0xff] }
  0x98   : > { %387 = vmatprep.subr.mxu0 %v278_v30  ;;  %1015 = vmatprep.subr.mxu1 %v278_v30  ;;  %v257_v30 = vld [vmem:[#allocation2 + $0x70] sm:$0xff] }
  0x9b   : > { %388 = vmatpush1.xpose.msra.mxu0 %v277_v31  ;;  %1047 = vmatpush1.xpose.msra.mxu1 %v277_v31  ;;  %v273_v31 = vld [vmem:[#allocation2 + $0xf0] sm:$0xff] }
  0x9c   : > { %389 = vmatprep.subr.mxu0 %v276_v32  ;;  %1016 = vmatprep.subr.mxu1 %v276_v32  ;;  %v341_v32 = vlaneseq }
  0x9f   : > { %390 = vmatpush1.xpose.msra.mxu0 %v275_v33  ;;  %1048 = vmatpush1.xpose.msra.mxu1 %v275_v33  ;;  %v1565_v33 = vshrl.u32 %v341_v32, 7 }
  0xa0   : > { %391 = vmatprep.subr.mxu0 %v338_v34  ;;  %1017 = vmatprep.subr.mxu1 %v338_v34 }
  0xa3   : > { %392 = vmatpush2.xpose.msra.mxu0 %v337_v35  ;;  %1049 = vmatpush2.xpose.msra.mxu1 %v337_v35 }
  0xa4   : > { %393 = vmatprep.subr.mxu0 %v336_v36  ;;  %1018 = vmatprep.subr.mxu1 %v336_v36 }
  0xa7   : > { %394 = vmatpush2.xpose.msra.mxu0 %v335_v37  ;;  %1050 = vmatpush2.xpose.msra.mxu1 %v335_v37 }
  0xa8   : > { %395 = vmatprep.subr.mxu0 %v334_v38  ;;  %1019 = vmatprep.subr.mxu1 %v334_v38  ;;  %v343_v38 = vsub.s32 0, %v1565_v33 }
  0xab   : > { %396 = vmatpush2.xpose.msra.mxu0 %v333_v39  ;;  %1051 = vmatpush2.xpose.msra.mxu1 %v333_v39  ;;  %v1572_v39 = vld [vmem:[%s212_s25] sm:$0x77] }
  0xac   : > { %397 = vmatprep.subr.mxu0 %v332_v40  ;;  %1020 = vmatprep.subr.mxu1 %v332_v40  ;;  %v347_v40 = vsub.s32 4, %v1565_v33 }
  0xaf   : > { %398 = vmatpush2.xpose.msra.mxu0 %v331_v41  ;;  %1052 = vmatpush2.xpose.msra.mxu1 %v331_v41 }
  0xb0   : > { %399 = vmatprep.subr.mxu0 %v330_v42  ;;  %1021 = vmatprep.subr.mxu1 %v330_v42 }
  0xb3   : > { %400 = vmatpush2.xpose.msra.mxu0 %v329_v43  ;;  %1053 = vmatpush2.xpose.msra.mxu1 %v329_v43 }
  0xb4   : > { %401 = vmatprep.subr.mxu0 %v328_v44  ;;  %1022 = vmatprep.subr.mxu1 %v328_v44 }
  0xb7   : > { %402 = vmatpush2.xpose.msra.mxu0 %v327_v45  ;;  %1054 = vmatpush2.xpose.msra.mxu1 %v327_v45  ;;  %v344_v45 = vrot.slane %v1572_v39, %v343_v38 }
  0xb8   : > { %403 = vmatprep.subr.mxu0 %v326_v46  ;;  %1023 = vmatprep.subr.mxu1 %v326_v46  ;;  %v348_v46 = vrot.slane %v1572_v39, %v347_v40 }
  0xbb   : > { %404 = vmatpush2.xpose.msra.mxu0 %v325_v47  ;;  %1055 = vmatpush2.xpose.msra.mxu1 %v325_v47 }
  0xbc   : > { %405 = vmatprep.subr.mxu0 %v324_v48  ;;  %1024 = vmatprep.subr.mxu1 %v324_v48 }
  0xbf   : > { %406 = vmatpush2.xpose.msra.mxu0 %v323_v49  ;;  %1056 = vmatpush2.xpose.msra.mxu1 %v323_v49 }
  0xc0   : > { %407 = vmatprep.subr.mxu0 %v322_v50  ;;  %1025 = vmatprep.subr.mxu1 %v322_v50 }
  0xc3   : > { %408 = vmatpush2.xpose.msra.mxu0 %v321_v51  ;;  %1057 = vmatpush2.xpose.msra.mxu1 %v321_v51  ;;  %v1585_v51 = vrot.slane %v344_v45, %v343_v38 }
  0xc4   : > { %409 = vmatprep.subr.mxu0 %v320_v52  ;;  %1026 = vmatprep.subr.mxu1 %v320_v52  ;;  %v1587_v52 = vrot.slane %v348_v46, %v343_v38 }
  0xc7   : > { %410 = vmatpush2.xpose.msra.mxu0 %v319_v53  ;;  %1058 = vmatpush2.xpose.msra.mxu1 %v319_v53 }
  0xc8   : > { %411 = vmatprep.subr.mxu0 %v318_v54  ;;  %1027 = vmatprep.subr.mxu1 %v318_v54 }
  0xcb   : > { %412 = vmatpush2.xpose.msra.mxu0 %v317_v55  ;;  %1059 = vmatpush2.xpose.msra.mxu1 %v317_v55 }
  0xcc   : > { %413 = vmatprep.subr.mxu0 %v316_v56  ;;  %1028 = vmatprep.subr.mxu1 %v316_v56 }
  0xcf   : > { %414 = vmatpush2.xpose.msra.mxu0 %v315_v57  ;;  %1060 = vmatpush2.xpose.msra.mxu1 %v315_v57 }
  0xd0   : > { %415 = vmatprep.subr.mxu0 %v314_v58  ;;  %1029 = vmatprep.subr.mxu1 %v314_v58 }
  0xd3   : > { %416 = vmatpush2.xpose.msra.mxu0 %v313_v59  ;;  %1061 = vmatpush2.xpose.msra.mxu1 %v313_v59 }
  0xd4   : > { %417 = vmatprep.subr.mxu0 %v312_v60  ;;  %1030 = vmatprep.subr.mxu1 %v312_v60 }
  0xd7   : > { %418 = vmatpush2.xpose.msra.mxu0 %v311_v61  ;;  %1062 = vmatpush2.xpose.msra.mxu1 %v311_v61 }
  0xd8   : > { %419 = vmatprep.subr.mxu0 %v310_v62  ;;  %1031 = vmatprep.subr.mxu1 %v310_v62 }
  0xdb   : > { %420 = vmatpush2.xpose.msra.mxu0 %v309_v63  ;;  %1063 = vmatpush2.xpose.msra.mxu1 %v309_v63 }
  0xdc   : > { %421 = vmatprep.subr.mxu0 %v308_v0  ;;  %1032 = vmatprep.subr.mxu1 %v308_v0 }
  0xdf   : > { %422 = vmatpush2.xpose.msra.mxu0 %v307_v1  ;;  %1064 = vmatpush2.xpose.msra.mxu1 %v307_v1 }
  0xe2   : > { %424 = vmatmul.mubr.f32.vlgmr.msra.gmra.mxu0 %v243_v2  ;;  %472 = vmatmul.mubr.f32.vlgmr.msra.gmra.mxu1 %v259_v3 }
  0xe3   : > { %429 = vmatprep.mubr.f32.mxu0 %v246_v4  ;;  %477 = vmatprep.mubr.f32.mxu1 %v262_v5 }
  0xe6   : > { %430 = vmatmul.mubr.f32.gmra.mxu0 %v245_v6  ;;  %478 = vmatmul.mubr.f32.gmra.mxu1 %v261_v7 }
  0xe7   : > { %435 = vmatprep.mubr.f32.mxu0 %v248_v8  ;;  %483 = vmatprep.mubr.f32.mxu1 %v264_v9 }
  0xea   : > { %436 = vmatmul.mubr.f32.gmra.mxu0 %v247_v10  ;;  %484 = vmatmul.mubr.f32.gmra.mxu1 %v263_v11 }
  0xeb   : > { %441 = vmatprep.mubr.f32.mxu0 %v250_v12  ;;  %489 = vmatprep.mubr.f32.mxu1 %v266_v13 }
  0xee   : > { %442 = vmatmul.mubr.f32.gmra.mxu0 %v249_v14  ;;  %490 = vmatmul.mubr.f32.gmra.mxu1 %v265_v15 }
  0xef   : > { %447 = vmatprep.mubr.f32.mxu0 %v252_v16  ;;  %495 = vmatprep.mubr.f32.mxu1 %v268_v17 }
  0xf2   : > { %448 = vmatmul.mubr.f32.gmra.mxu0 %v251_v18  ;;  %496 = vmatmul.mubr.f32.gmra.mxu1 %v267_v19 }
  0xf3   : > { %453 = vmatprep.mubr.f32.mxu0 %v254_v20  ;;  %501 = vmatprep.mubr.f32.mxu1 %v270_v21 }
  0xf6   : > { %454 = vmatmul.mubr.f32.gmra.mxu0 %v253_v22  ;;  %502 = vmatmul.mubr.f32.gmra.mxu1 %v269_v23 }
  0xf7   : > { %459 = vmatprep.mubr.f32.mxu0 %v256_v24  ;;  %507 = vmatprep.mubr.f32.mxu1 %v272_v25 }
  0xfa   : > { %460 = vmatmul.mubr.f32.gmra.mxu0 %v255_v26  ;;  %508 = vmatmul.mubr.f32.gmra.mxu1 %v271_v27 }
  0xfb   : > { %465 = vmatprep.mubr.f32.mxu0 %v258_v28  ;;  %513 = vmatprep.mubr.f32.mxu1 %v274_v29 }
  0xfe   : > { %466 = vmatmul.mubr.f32.gmra.mxu0 %v257_v30  ;;  %514 = vmatmul.mubr.f32.gmra.mxu1 %v273_v31 }
 0x1a2   : > { %v425_v34 = vpop.f32.mrf.mxu0  ;;  %v1567_v35 = vpop.f32.mrf.mxu1 }
 0x1a3   : > { %v426_v59 = vadd.f32 %v425_v34, %v1585_v51 }
 0x1a4   : > { %v427_v36 = vpop.f32.mrf.mxu0  ;;  %v1569_v37 = vpop.f32.mrf.mxu1 }
 0x1a5   : > { %v428_v61 = vadd.f32 %v427_v36, %v1587_v52  ;;  %v1609_v7 = vmax.f32 %v426_v59, 0.0 }
 0x1a6   : > { %v431_v41 = vpop.f32.mrf.mxu0  ;;  %v1575_v42 = vpop.f32.mrf.mxu1 }
 0x1a7   : > { %v432_v55 = vadd.f32 %v431_v41, %v1585_v51  ;;  %v1614_v10 = vmax.f32 %v428_v61, 0.0  ;;  %v474_v41 = vadd.f32 %v1567_v35, %v1585_v51 }
 0x1a8   : > { %v433_v43 = vpop.f32.mrf.mxu0  ;;  %v1577_v44 = vpop.f32.mrf.mxu1 }
 0x1a9   : > { %v434_v56 = vadd.f32 %v433_v43, %v1587_v52  ;;  %v1601_v1 = vmax.f32 %v432_v55, 0.0  ;;  %v480_v55 = vadd.f32 %v1575_v42, %v1585_v51 }
 0x1aa   : > { %v437_v47 = vpop.f32.mrf.mxu0  ;;  %v1581_v48 = vpop.f32.mrf.mxu1 }
 0x1ab   : > { %v438_v60 = vadd.f32 %v437_v47, %v1585_v51  ;;  %v1604_v3 = vmax.f32 %v434_v56, 0.0  ;;  %v552_v13 = vadd.f32 %v1601_v1, %v1609_v7 }
 0x1ac   : > { %v439_v49 = vpop.f32.mrf.mxu0  ;;  %v1583_v50 = vpop.f32.mrf.mxu1 }
 0x1ad   : > { %v440_v62 = vadd.f32 %v439_v49, %v1587_v52  ;;  %v1611_v8 = vmax.f32 %v438_v60, 0.0  ;;  %v573_v17 = vadd.f32 %v1604_v3, %v1614_v10 }
 0x1ae   : > { %v443_v53 = vpop.f32.mrf.mxu0  ;;  %v1589_v54 = vpop.f32.mrf.mxu1 }
 0x1af   : > { %v444_v2 = vadd.f32 %v443_v53, %v1585_v51  ;;  %v1616_v11 = vmax.f32 %v440_v62, 0.0  ;;  %v553_v21 = vadd.f32 %v552_v13, %v1611_v8  ;;  %v476_v53 = vadd.f32 %v1569_v37, %v1587_v52 }
 0x1b0   : > { %v445_v57 = vpop.f32.mrf.mxu0  ;;  %v1593_v58 = vpop.f32.mrf.mxu1  ;;  %v1662_v62 = vmax.f32 %v474_v41, 0.0  ;;  %v486_v37 = vadd.f32 %v1581_v48, %v1585_v51  ;;  %v1676_v13 = vmax.f32 %v480_v55, 0.0 }
 0x1b1   : > { %v446_v4 = vadd.f32 %v445_v57, %v1587_v52  ;;  %v1620_v14 = vmax.f32 %v444_v2, 0.0  ;;  %v574_v24 = vadd.f32 %v573_v17, %v1616_v11  ;;  %v494_v17 = vadd.f32 %v1593_v58, %v1587_v52 }
 0x1b2   : > { %v449_v63 = vpop.f32.mrf.mxu0  ;;  %v1599_v0 = vpop.f32.mrf.mxu1 }
 0x1b3   : > { %v450_v9 = vadd.f32 %v449_v63, %v1585_v51  ;;  %v1626_v18 = vmax.f32 %v446_v4, 0.0  ;;  %v554_v26 = vadd.f32 %v553_v21, %v1620_v14  ;;  %v482_v63 = vadd.f32 %v1577_v44, %v1587_v52 }
 0x1b4   : > { %v451_v5 = vpop.f32.mrf.mxu0  ;;  %v1607_v6 = vpop.f32.mrf.mxu1  ;;  %v492_v44 = vadd.f32 %v1589_v54, %v1585_v51 }
 0x1b5   : > { %v452_v15 = vadd.f32 %v451_v5, %v1587_v52  ;;  %v1629_v22 = vmax.f32 %v450_v9, 0.0  ;;  %v575_v30 = vadd.f32 %v574_v24, %v1626_v18  ;;  %v1672_v5 = vmax.f32 %v476_v53, 0.0 }
 0x1b6   : > { %v455_v12 = vpop.f32.mrf.mxu0  ;;  %v503_v20 = vpop.f32.mrf.mxu1  ;;  %v488_v9 = vadd.f32 %v1583_v50, %v1587_v52  ;;  %v500_v54 = vadd.f32 %v1607_v6, %v1587_v52 }
 0x1b7   : > { %v456_v16 = vadd.f32 %v455_v12, %v1585_v51  ;;  %v1634_v27 = vmax.f32 %v452_v15, 0.0  ;;  %v555_v34 = vadd.f32 %v554_v26, %v1629_v22  ;;  %v1696_v26 = vmax.f32 %v492_v44, 0.0 }
 0x1b8   : > { %v457_v19 = vpop.f32.mrf.mxu0  ;;  %v505_v32 = vpop.f32.mrf.mxu1  ;;  %v1692_v24 = vmax.f32 %v488_v9, 0.0 }
 0x1b9   : > { %v458_v23 = vadd.f32 %v457_v19, %v1587_v52  ;;  %v1636_v28 = vmax.f32 %v456_v16, 0.0  ;;  %v576_v45 = vadd.f32 %v575_v30, %v1634_v27  ;;  %v1682_v16 = vmax.f32 %v482_v63, 0.0 }
 0x1ba   : > { %v461_v25 = vpop.f32.mrf.mxu0  ;;  %v509_v57 = vpop.f32.mrf.mxu1  ;;  %v1686_v19 = vmax.f32 %v486_v37, 0.0  ;;  %v504_v30 = vadd.f32 %v503_v20, %v1585_v51 }
 0x1bb   : > { %v462_v29 = vadd.f32 %v461_v25, %v1585_v51  ;;  %v1641_v36 = vmax.f32 %v458_v23, 0.0  ;;  %v556_v46 = vadd.f32 %v555_v34, %v1636_v28  ;;  %v498_v23 = vadd.f32 %v1599_v0, %v1585_v51 }
 0x1bc   : > { %v463_v31 = vpop.f32.mrf.mxu0  ;;  %v511_v12 = vpop.f32.mrf.mxu1  ;;  %v506_v34 = vadd.f32 %v505_v32, %v1587_v52  ;;  %v510_v0 = vadd.f32 %v509_v57, %v1585_v51  ;;  %v1714_v53 = vmax.f32 %v504_v30, 0.0 }
 0x1bd   : > { %v1643_v38 = vmax.f32 %v462_v29, 0.0  ;;  %v464_v40 = vadd.f32 %v463_v31, %v1587_v52  ;;  %v577_v59 = vadd.f32 %v576_v45, %v1641_v36  ;;  %v1701_v31 = vmax.f32 %v494_v17, 0.0 }
 0x1be   : > { %v467_v43 = vpop.f32.mrf.mxu0  ;;  %v515_v25 = vpop.f32.mrf.mxu1  ;;  %v1710_v45 = vmax.f32 %v500_v54, 0.0  ;;  %v512_v32 = vadd.f32 %v511_v12, %v1587_v52  ;;  %v1717_v55 = vmax.f32 %v506_v34, 0.0 }
 0x1bf   : > { %v1650_v47 = vmax.f32 %v464_v40, 0.0  ;;  %v468_v49 = vadd.f32 %v467_v43, %v1585_v51  ;;  %v557_v35 = vadd.f32 %v556_v46, %v1643_v38  ;;  %v1705_v40 = vmax.f32 %v498_v23, 0.0 }
 0x1c0   : > { %v469_v56 = vpop.f32.mrf.mxu0  ;;  %v516_v43 = vadd.f32 %v515_v25, %v1585_v51  ;;  %v517_v46 = vpop.f32.mrf.mxu1  ;;  %v1728_v37 = vmax.f32 %v512_v32, 0.0 }
 0x1c1   : > { %v1659_v60 = vmax.f32 %v468_v49, 0.0  ;;  %v470_v61 = vadd.f32 %v469_v56, %v1587_v52  ;;  %v578_v42 = vadd.f32 %v577_v59, %v1650_v47  ;;  %v1719_v56 = vmax.f32 %v510_v0, 0.0 }
 0x1c2   : > { %v1723_v51 = vmax.f32 %v516_v43, 0.0 }
 0x1c3   : > { %v558_v2 = vadd.f32 %v557_v35, %v1659_v60  ;;  %v1670_v4 = vmax.f32 %v470_v61, 0.0  ;;  %v518_v35 = vadd.f32 %v517_v46, %v1587_v52 }
 0x1c5   : > { %v559_v15 = vadd.f32 %v558_v2, %v1662_v62  ;;  %v579_v48 = vadd.f32 %v578_v42, %v1670_v4  ;;  %v1732_v9 = vmax.f32 %v518_v35, 0.0 }
 0x1c7   : > { %v560_v21 = vadd.f32 %v559_v15, %v1676_v13  ;;  %v580_v50 = vadd.f32 %v579_v48, %v1672_v5 }
 0x1c9   : > { %v581_v29 = vadd.f32 %v580_v50, %v1682_v16  ;;  %v561_v58 = vadd.f32 %v560_v21, %v1686_v19 }
 0x1cb   : > { %v562_v41 = vadd.f32 %v561_v58, %v1696_v26  ;;  %v582_v6 = vadd.f32 %v581_v29, %v1692_v24 }
 0x1cd   : > { %v563_v49 = vadd.f32 %v562_v41, %v1705_v40  ;;  %v583_v20 = vadd.f32 %v582_v6, %v1701_v31 }
 0x1cf   : > { %v584_v57 = vadd.f32 %v583_v20, %v1710_v45  ;;  %v564_v59 = vadd.f32 %v563_v49, %v1714_v53 }
 0x1d1   : > { %v585_v61 = vadd.f32 %v584_v57, %v1717_v55  ;;  %v565_v63 = vadd.f32 %v564_v59, %v1719_v56 }
 0x1d3   : > { %v586_v42 = vadd.f32 %v585_v61, %v1728_v37  ;;  %v566_v2 = vadd.f32 %v565_v63, %v1723_v51 }
 0x1d5   : > { %v567_v12 = vrot.slane %v566_v2, 4  ;;  %v587_v44 = vadd.f32 %v586_v42, %v1732_v9 }
 0x1d7   : > { %v568_v15 = vadd.f32 %v567_v12, %v566_v2  ;;  %v588_v48 = vrot.slane %v587_v44, 4 }
 0x1d9   : > { %v569_v17 = vrot.slane %v568_v15, 2  ;;  %v589_v21 = vadd.f32 %v588_v48, %v587_v44 }
 0x1db   : > { %v570_v52 = vadd.f32 %v569_v17, %v568_v15  ;;  %v590_v50 = vrot.slane %v589_v21, 2 }
 0x1dd   : > { %v571_v23 = vrot.slane %v570_v52, 1  ;;  %v591_v25 = vadd.f32 %v590_v50, %v589_v21 }
 0x1df   : > { %v572_v54 = vadd.f32 %v571_v23, %v570_v52  ;;  %v592_v34 = vrot.slane %v591_v25, 1 }
 0x1e1   : > { %v1735_v29 = vmul.f32 0.0078125, %v572_v54  ;;  %v593_v43 = vadd.f32 %v592_v34, %v591_v25 }
 0x1e3   : > { %v597_v58 = vsub.f32 %v1609_v7, %v1735_v29  ;;  %v599_v30 = vsub.f32 %v1601_v1, %v1735_v29  ;;  %v601_v0 = vsub.f32 %v1611_v8, %v1735_v29  ;;  %v603_v46 = vsub.f32 %v1620_v14, %v1735_v29 }
 0x1e4   : > { %v605_v49 = vsub.f32 %v1629_v22, %v1735_v29  ;;  %v1747_v57 = vmul.f32 0.0078125, %v593_v43  ;;  %v607_v59 = vsub.f32 %v1636_v28, %v1735_v29  ;;  %v609_v2 = vsub.f32 %v1643_v38, %v1735_v29 }
 0x1e5   : > { %v629_v41 = vmul.f32 %v597_v58, %v597_v58  ;;  %v631_v6 = vmul.f32 %v599_v30, %v599_v30  ;;  %v633_v20 = vmul.f32 %v601_v0, %v601_v0  ;;  %v635_v35 = vmul.f32 %v603_v46, %v603_v46 }
 0x1e6   : > { %v598_v63 = vsub.f32 %v1614_v10, %v1747_v57  ;;  %v600_v42 = vsub.f32 %v1604_v3, %v1747_v57  ;;  %v637_v12 = vmul.f32 %v605_v49, %v605_v49  ;;  %v611_v15 = vsub.f32 %v1659_v60, %v1735_v29 }
 0x1e7   : > { %v661_v32 = vadd.f32 %v631_v6, %v629_v41  ;;  %v639_v48 = vmul.f32 %v607_v59, %v607_v59  ;;  %v602_v21 = vsub.f32 %v1616_v11, %v1747_v57  ;;  %v613_v23 = vsub.f32 %v1662_v62, %v1735_v29 }
 0x1e8   : > { %v630_v52 = vmul.f32 %v598_v63, %v598_v63  ;;  %v632_v50 = vmul.f32 %v600_v42, %v600_v42  ;;  %v641_v54 = vmul.f32 %v609_v2, %v609_v2  ;;  %v604_v58 = vsub.f32 %v1626_v18, %v1747_v57 }
 0x1e9   : > { %v662_v61 = vadd.f32 %v661_v32, %v633_v20  ;;  %v615_v30 = vsub.f32 %v1676_v13, %v1735_v29  ;;  %v643_v34 = vmul.f32 %v611_v15, %v611_v15  ;;  %v606_v41 = vsub.f32 %v1634_v27, %v1747_v57 }
 0x1ea   : > { %v634_v6 = vmul.f32 %v602_v21, %v602_v21  ;;  %v682_v43 = vadd.f32 %v632_v50, %v630_v52  ;;  %v617_v46 = vsub.f32 %v1686_v19, %v1735_v29  ;;  %v645_v49 = vmul.f32 %v613_v23, %v613_v23 }
 0x1eb   : > { %v663_v44 = vadd.f32 %v662_v61, %v635_v35  ;;  %v608_v32 = vsub.f32 %v1641_v36, %v1747_v57  ;;  %v636_v59 = vmul.f32 %v604_v58, %v604_v58  ;;  %v619_v61 = vsub.f32 %v1696_v26, %v1735_v29 }
 0x1ec   : > { %v683_v35 = vadd.f32 %v682_v43, %v634_v6  ;;  %v647_v63 = vmul.f32 %v615_v30, %v615_v30  ;;  %v610_v2 = vsub.f32 %v1650_v47, %v1747_v57  ;;  %v621_v15 = vsub.f32 %v1705_v40, %v1735_v29 }
 0x1ed   : > { %v664_v17 = vadd.f32 %v663_v44, %v637_v12  ;;  %v638_v12 = vmul.f32 %v606_v41, %v606_v41  ;;  %v612_v21 = vsub.f32 %v1670_v4, %v1747_v57  ;;  %v640_v52 = vmul.f32 %v608_v32, %v608_v32 }
 0x1ee   : > { %v684_v44 = vadd.f32 %v683_v35, %v636_v59  ;;  %v623_v23 = vsub.f32 %v1714_v53, %v1735_v29  ;;  %v614_v58 = vsub.f32 %v1672_v5, %v1747_v57  ;;  %v642_v30 = vmul.f32 %v610_v2, %v610_v2 }
 0x1ef   : > { %v665_v25 = vadd.f32 %v664_v17, %v639_v48  ;;  %v649_v48 = vmul.f32 %v617_v46, %v617_v46  ;;  %v653_v41 = vmul.f32 %v621_v15, %v621_v15  ;;  %v616_v43 = vsub.f32 %v1682_v16, %v1747_v57 }
 0x1f0   : > { %v685_v50 = vadd.f32 %v684_v44, %v638_v12  ;;  %v644_v46 = vmul.f32 %v612_v21, %v612_v21  ;;  %v655_v32 = vmul.f32 %v623_v23, %v623_v23  ;;  %v618_v35 = vsub.f32 %v1692_v24, %v1747_v57 }
 0x1f1   : > { %v666_v0 = vadd.f32 %v665_v25, %v641_v54  ;;  %v651_v54 = vmul.f32 %v619_v61, %v619_v61  ;;  %v646_v61 = vmul.f32 %v614_v58, %v614_v58  ;;  %v620_v12 = vsub.f32 %v1701_v31, %v1747_v57 }
 0x1f2   : > { %v648_v44 = vmul.f32 %v616_v43, %v616_v43  ;;  %v622_v21 = vsub.f32 %v1710_v45, %v1747_v57  ;;  %v628_v43 = vsub.f32 %v1732_v9, %v1747_v57 }
 0x1f3   : > { %v667_v20 = vadd.f32 %v666_v0, %v643_v34  ;;  %v686_v34 = vadd.f32 %v685_v50, %v640_v52  ;;  %v625_v0 = vsub.f32 %v1719_v56, %v1735_v29  ;;  %v650_v52 = vmul.f32 %v618_v35, %v618_v35 }
 0x1f5   : > { %v668_v42 = vadd.f32 %v667_v20, %v645_v49  ;;  %v687_v49 = vadd.f32 %v686_v34, %v642_v30  ;;  %v627_v20 = vsub.f32 %v1723_v51, %v1735_v29  ;;  %v626_v34 = vsub.f32 %v1728_v37, %v1747_v57 }
 0x1f7   : > { %v669_v17 = vadd.f32 %v668_v42, %v647_v63  ;;  %v688_v63 = vadd.f32 %v687_v49, %v644_v46  ;;  %v657_v42 = vmul.f32 %v625_v0, %v625_v0  ;;  %v654_v0 = vmul.f32 %v622_v21, %v622_v21 }
 0x1f9   : > { %v670_v25 = vadd.f32 %v669_v17, %v649_v48  ;;  %v689_v15 = vadd.f32 %v688_v63, %v646_v61  ;;  %v659_v48 = vmul.f32 %v627_v20, %v627_v20  ;;  %v660_v61 = vmul.f32 %v628_v43, %v628_v43 }
 0x1fb   : > { %v671_v6 = vadd.f32 %v670_v25, %v651_v54  ;;  %v690_v50 = vadd.f32 %v689_v15, %v648_v44  ;;  %v624_v54 = vsub.f32 %v1717_v55, %v1747_v57  ;;  %v652_v25 = vmul.f32 %v620_v12, %v620_v12 }
 0x1fd   : > { %v672_v59 = vadd.f32 %v671_v6, %v653_v41  ;;  %v691_v58 = vadd.f32 %v690_v50, %v650_v52  ;;  %v656_v46 = vmul.f32 %v624_v54, %v624_v54 }
 0x1ff   : > { %v673_v2 = vadd.f32 %v672_v59, %v655_v32  ;;  %v692_v41 = vadd.f32 %v691_v58, %v652_v25  ;;  %v658_v32 = vmul.f32 %v626_v34, %v626_v34 }
 0x201   : > { %v674_v17 = vadd.f32 %v673_v2, %v657_v42  ;;  %v693_v49 = vadd.f32 %v692_v41, %v654_v0  ;;  %v718_v41 = vsub.s32 1, %v1565_v33 }
 0x203   : > { %v675_v23 = vadd.f32 %v674_v17, %v659_v48  ;;  %v694_v59 = vadd.f32 %v693_v49, %v656_v46 }
 0x205   : > { %v676_v30 = vrot.slane %v675_v23, 4  ;;  %v695_v63 = vadd.f32 %v694_v59, %v658_v32 }
 0x207   : > { %v677_v6 = vadd.f32 %v676_v30, %v675_v23  ;;  %v696_v42 = vadd.f32 %v695_v63, %v660_v61 }
 0x209   : > { %v678_v20 = vrot.slane %v677_v6, 2  ;;  %v697_v12 = vrot.slane %v696_v42, 4 }
 0x20b   : > { %v679_v35 = vadd.f32 %v678_v20, %v677_v6  ;;  %v698_v44 = vadd.f32 %v697_v12, %v696_v42  ;;  %v722_v6 = vsub.s32 5, %v1565_v33  ;;  %v781_v12 = vsub.s32 6, %v1565_v33 }
 0x20d   : > { %v680_v2 = vrot.slane %v679_v35, 1  ;;  %v699_v48 = vrot.slane %v698_v44, 2 }
 0x20f   : > { %v681_v15 = vadd.f32 %v680_v2, %v679_v35  ;;  %v700_v17 = vadd.f32 %v699_v48, %v698_v44  ;;  %v777_v2 = vsub.s32 2, %v1565_v33 }
 0x211   : > { %v703_v21 = vmul.f32 0.0078125, %v681_v15  ;;  %v701_v52 = vrot.slane %v700_v17, 1 }
 0x213   : > { %v702_v50 = vadd.f32 %v701_v52, %v700_v17  ;;  %v705_v23 = vadd.f32 1e-05, %v703_v21 }
 0x215   : > { %v704_v25 = vmul.f32 0.0078125, %v702_v50  ;;  %1132 = vrsqrt.f32 %v705_v23 }
 0x217   : > { %v706_v54 = vadd.f32 1e-05, %v704_v25 }
 0x219   : > { %1134 = vrsqrt.f32 %v706_v54 }
 0x222   : > { %v1133_v58 = vpop.eup %1132 }
 0x226   : > { %v1135_v30 = vpop.eup %1134 }
 0x227   : > { %v711_v34 = vcombine.low %v1133_v58, %v1135_v30 }
 0x229   : > { %v712_v0 = vrot.slane %v711_v34, 7 }
 0x22b   : > { %v714_v43 = vmul.f32 %v712_v0, %v1572_v39 }
 0x22d   : > { %v719_v46 = vrot.slane %v714_v43, %v718_v41  ;;  %v723_v49 = vrot.slane %v714_v43, %v722_v6 }
 0x22f   : > { %v726_v20 = vmul.f32 %v719_v46, %v1735_v29  ;;  %v727_v32 = vmul.f32 %v723_v49, %v1747_v57  ;;  %v737_v59 = vrot.slane %v719_v46, %v718_v41  ;;  %v741_v35 = vrot.slane %v723_v49, %v718_v41 }
 0x231   : > { %v730_v61 = vcombine.low %v726_v20, %v727_v32  ;;  %v742_v42 = vmul.f32 %v737_v59, %v1609_v7  ;;  %v743_v44 = vmul.f32 %v741_v35, %v1614_v10  ;;  %v744_v15 = vmul.f32 %v737_v59, %v1601_v1 }
 0x232   : > { %v745_v48 = vmul.f32 %v741_v35, %v1604_v3  ;;  %v746_v29 = vmul.f32 %v737_v59, %v1611_v8  ;;  %v747_v17 = vmul.f32 %v741_v35, %v1616_v11  ;;  %v748_v21 = vmul.f32 %v737_v59, %v1620_v14 }
 0x233   : > { %v731_v63 = vrot.slane %v730_v61, 6  ;;  %v749_v7 = vmul.f32 %v741_v35, %v1626_v18  ;;  %v750_v52 = vmul.f32 %v737_v59, %v1629_v22  ;;  %v751_v33 = vmul.f32 %v741_v35, %v1634_v27 }
 0x234   : > { %v752_v10 = vmul.f32 %v737_v59, %v1636_v28  ;;  %v753_v1 = vmul.f32 %v741_v35, %v1641_v36  ;;  %v754_v3 = vmul.f32 %v737_v59, %v1643_v38  ;;  %v755_v8 = vmul.f32 %v741_v35, %v1650_v47 }
 0x235   : > { %v733_v57 = vsub.f32 %v1572_v39, %v731_v63  ;;  %v756_v39 = vmul.f32 %v737_v59, %v1659_v60  ;;  %v757_v11 = vmul.f32 %v741_v35, %v1670_v4  ;;  %v758_v14 = vmul.f32 %v737_v59, %v1662_v62 }
 0x236   : > { %v759_v18 = vmul.f32 %v741_v35, %v1672_v5  ;;  %v760_v22 = vmul.f32 %v737_v59, %v1676_v13  ;;  %v761_v27 = vmul.f32 %v741_v35, %v1682_v16  ;;  %v762_v28 = vmul.f32 %v737_v59, %v1686_v19 }
 0x237   : > { %v763_v36 = vmul.f32 %v741_v35, %v1692_v24  ;;  %v764_v38 = vmul.f32 %v737_v59, %v1696_v26  ;;  %v778_v47 = vrot.slane %v733_v57, %v777_v2  ;;  %v765_v60 = vmul.f32 %v741_v35, %v1701_v31 }
 0x238   : > { %v766_v4 = vmul.f32 %v737_v59, %v1705_v40  ;;  %v767_v62 = vmul.f32 %v741_v35, %v1710_v45  ;;  %v782_v50 = vrot.slane %v733_v57, %v781_v12  ;;  %v768_v5 = vmul.f32 %v737_v59, %v1714_v53 }
 0x239   : > { %v769_v13 = vmul.f32 %v741_v35, %v1717_v55  ;;  %v770_v16 = vmul.f32 %v737_v59, %v1719_v56  ;;  %v788_v23 = vrot.slane %v778_v47, %v777_v2  ;;  %v771_v19 = vmul.f32 %v741_v35, %v1728_v37 }
 0x23a   : > { %v772_v24 = vmul.f32 %v737_v59, %v1723_v51  ;;  %v773_v26 = vmul.f32 %v741_v35, %v1732_v9  ;;  %v792_v25 = vrot.slane %v782_v50, %v777_v2 }
 0x23b   : > { %v793_v31 = vadd.f32 %v788_v23, %v742_v42  ;;  %v795_v54 = vadd.f32 %v788_v23, %v744_v15  ;;  %v797_v40 = vadd.f32 %v788_v23, %v746_v29  ;;  %v799_v45 = vadd.f32 %v788_v23, %v748_v21 }
 0x23c   : > { %v794_v58 = vadd.f32 %v792_v25, %v743_v44  ;;  %v796_v30 = vadd.f32 %v792_v25, %v745_v48  ;;  %v798_v53 = vadd.f32 %v792_v25, %v747_v17  ;;  %v800_v34 = vadd.f32 %v792_v25, %v749_v7 }
 0x23d   : > { %v801_v55 = vadd.f32 %v788_v23, %v750_v52  ;;  %v802_v0 = vadd.f32 %v792_v25, %v751_v33  ;;  %v803_v56 = vadd.f32 %v788_v23, %v752_v10  ;;  %v804_v41 = vadd.f32 %v792_v25, %v753_v1  ;;  %825 = vst [vmem:[%s1844_s6] sm:$0xff] %v793_v31 }
 0x23e   : > { %827 = vst [vmem:[%s1844_s6 + $0x10] sm:$0xff] %v795_v54  ;;  %829 = vst [vmem:[%s1844_s6 + $0x20] sm:$0xff] %v797_v40  ;;  %v805_v51 = vadd.f32 %v788_v23, %v754_v3  ;;  %v806_v37 = vadd.f32 %v792_v25, %v755_v8  ;;  %v807_v9 = vadd.f32 %v788_v23, %v756_v39 }
 0x23f   : > { %831 = vst [vmem:[%s1844_s6 + $0x30] sm:$0xff] %v799_v45  ;;  %v808_v6 = vadd.f32 %v792_v25, %v757_v11  ;;  %826 = vst [vmem:[%s1844_s6 + $0x8] sm:$0xff] %v794_v58  ;;  %v809_v43 = vadd.f32 %v788_v23, %v758_v14  ;;  %v810_v46 = vadd.f32 %v792_v25, %v759_v18 }
 0x240   : > { %828 = vst [vmem:[%s1844_s6 + $0x18] sm:$0xff] %v796_v30  ;;  %830 = vst [vmem:[%s1844_s6 + $0x28] sm:$0xff] %v798_v53  ;;  %v811_v49 = vadd.f32 %v788_v23, %v760_v22  ;;  %v812_v20 = vadd.f32 %v792_v25, %v761_v27  ;;  %v813_v32 = vadd.f32 %v788_v23, %v762_v28 }
 0x241   : > { %832 = vst [vmem:[%s1844_s6 + $0x38] sm:$0xff] %v800_v34  ;;  %833 = vst [vmem:[%s1844_s6 + $0x40] sm:$0xff] %v801_v55  ;;  %v814_v59 = vadd.f32 %v792_v25, %v763_v36  ;;  %v815_v35 = vadd.f32 %v788_v23, %v764_v38  ;;  %v816_v61 = vadd.f32 %v792_v25, %v765_v60 }
 0x242   : > { %834 = vst [vmem:[%s1844_s6 + $0x48] sm:$0xff] %v802_v0  ;;  %835 = vst [vmem:[%s1844_s6 + $0x50] sm:$0xff] %v803_v56  ;;  %v817_v63 = vadd.f32 %v788_v23, %v766_v4  ;;  %v818_v42 = vadd.f32 %v792_v25, %v767_v62  ;;  %v819_v2 = vadd.f32 %v788_v23, %v768_v5 }
 0x243   : > { %836 = vst [vmem:[%s1844_s6 + $0x58] sm:$0xff] %v804_v41  ;;  %837 = vst [vmem:[%s1844_s6 + $0x60] sm:$0xff] %v805_v51  ;;  %v820_v12 = vadd.f32 %v792_v25, %v769_v13  ;;  %v821_v44 = vadd.f32 %v788_v23, %v770_v16  ;;  %v822_v15 = vadd.f32 %v792_v25, %v771_v19 }
 0x244   : > { %838 = vst [vmem:[%s1844_s6 + $0x68] sm:$0xff] %v806_v37  ;;  %839 = vst [vmem:[%s1844_s6 + $0x70] sm:$0xff] %v807_v9  ;;  %v823_v48 = vadd.f32 %v788_v23, %v772_v24  ;;  %v824_v29 = vadd.f32 %v792_v25, %v773_v26 }
 0x245   : > { %840 = vst [vmem:[%s1844_s6 + $0x78] sm:$0xff] %v808_v6  ;;  %841 = vst [vmem:[%s1844_s6 + $0x80] sm:$0xff] %v809_v43 }
 0x246   : > { %842 = vst [vmem:[%s1844_s6 + $0x88] sm:$0xff] %v810_v46  ;;  %843 = vst [vmem:[%s1844_s6 + $0x90] sm:$0xff] %v811_v49 }
 0x247   : > { %844 = vst [vmem:[%s1844_s6 + $0x98] sm:$0xff] %v812_v20  ;;  %845 = vst [vmem:[%s1844_s6 + $0xa0] sm:$0xff] %v813_v32 }
 0x248   : > { %846 = vst [vmem:[%s1844_s6 + $0xa8] sm:$0xff] %v814_v59  ;;  %847 = vst [vmem:[%s1844_s6 + $0xb0] sm:$0xff] %v815_v35 }
 0x249   : > { %848 = vst [vmem:[%s1844_s6 + $0xb8] sm:$0xff] %v816_v61  ;;  %849 = vst [vmem:[%s1844_s6 + $0xc0] sm:$0xff] %v817_v63 }
 0x24a   : > { %850 = vst [vmem:[%s1844_s6 + $0xc8] sm:$0xff] %v818_v42  ;;  %851 = vst [vmem:[%s1844_s6 + $0xd0] sm:$0xff] %v819_v2 }
 0x24b   : > { %852 = vst [vmem:[%s1844_s6 + $0xd8] sm:$0xff] %v820_v12  ;;  %853 = vst [vmem:[%s1844_s6 + $0xe0] sm:$0xff] %v821_v44 }
 0x24c   : > { %854 = vst [vmem:[%s1844_s6 + $0xe8] sm:$0xff] %v822_v15  ;;  %855 = vst [vmem:[%s1844_s6 + $0xf0] sm:$0xff] %v823_v48 }
 0x24d   : > { %856 = vst [vmem:[%s1844_s6 + $0xf8] sm:$0xff] %v824_v29 }
 0x24e   : > { %1231 = shalt.err (!%p1228_p1)
}
 0x24f   : > { %s1232_s10 = scalar_lea.hbm %s1867_s21, 4096  ;;  %s1236_s7 = scalar_lea.hbm %s1931_s3, 8192 }
 0x250   : > { %p1233_p9 = scmp.ne.s32.totalorder %s1867_s21, %s1232_s10  ;;  %p1237_p7 = scmp.lt.s32.totalorder %s1867_s21, %s1931_s3 }
 0x251   : > { %p1238_p0 = scmp.lt.s32.totalorder %s1236_s7, %s1232_s10 }
 0x252   : > { %p1234_p11 = pnand %p1233_p9, %p1950_p8 }
 0x253   : > { %p1239_p4 = por %p1238_p0, %p1237_p7 }
 0x254   : > { %p1235_p6 = pneg %p1234_p11 }
 0x256   : > { %p1240_p12 = pnand %p1239_p4, %p1235_p6 }
 0x258   : > { %1243 = shalt.err (!%p1240_p12)
}
 0x259   : > { %s1294_s4 = smov 256   ;;  %s1295_s6 = smov 512  }
 0x25a   : > { %s1296_s8 = smov 16  }
 0x25b   : > { %1073 = dma.vmem_to_hbm [thread:$0]  (%p1950_p8), %s1873_s9, 4096, %s1867_s21, %s858_s24, %s1294_s4, %s1295_s6, %s1296_s8  }
 0x25c PF: > { %s886_s23 = sand.u32 1, %s1274_s12   ;;  %p1951_p10 = scmp.ne.s32.totalorder %s1941_s27, 0 }
 0x25d   : > { %p1952_p3 = scmp.ge.s32.totalorder %s1286_s15, 2  ;;  %s887_s28 = scalar_lea.sflag [#allocation4], %s886_s23 }
 0x25f   : > { %p1087_p5 = pnand %p1952_p3, %p1951_p10 }
 0x261   : > { %p1088_p13 = pneg %p1087_p5 }
 0x263   : > { %1269 = dma.done.wait (%p1088_p13), %s887_s28, 4096  }
 0x264   : > { %1271 = vsyncadd (%p1088_p13), %s887_s28, 4294963200  ;;  %p17_p2 = scmp.ge.s32.totalorder %s1338_s16, 4   ;;  %s1953_s12 = smov %s1278_s13 }
 0x265   : > { %s1954_s13 = smov %s1282_s14  ;;  %s1955_s14 = smov %s1347_s19 }
 0x266   : > { %s1956_s15 = smov %s1338_s16  ;;  %19 = sbr.rel (!%p17_p2) target bundleno = 6 (0x6), region = 93 }
 0x26b   :  { %892 = vsyncpa [#allocation3], 1 }
 0x26c   :  { %894 = vsyncpa [#allocation3 + $0x1], 1 }
 0x26d   :  { %895 = vsyncpa [#allocation6], 1 }
 0x26e   :  { %897 = vsyncpa [#allocation6 + $0x1], 1 }
 0x26f   :  { %898 = vsyncpa [#allocation4], 1 }
 0x270   :  { %900 = vsyncpa [#allocation4 + $0x1], 1 }

</bundles_post_ra>
